<compile_context>
chip_gen: v7x
topology: tpu7x:2x2x1
jax: 0.10.0
libtpu: 0.0.40
codegen_flags: <defaults>
</compile_context>

<pallas_src>
import jax
import jax.numpy as jnp
from jax import lax
from jax.experimental import pallas as pl
from jax.experimental.pallas import tpu as pltpu


# --------------------------------------------------------------------------
# Kernel factory (hw_true / hw_pad are static Python ints baked in).
# --------------------------------------------------------------------------
def _make_kernel(hw_true: int, hw_pad: int):
    inv_hw = 1.0 / float(hw_true)
    need_mask = hw_pad != hw_true

    def kernel(x_ref, w1_ref, w2_ref, o_ref):
        Bn = x_ref.shape[0]

        # ---- Global average / max pooling over the spatial (lane) axis ----
        xf = x_ref[...].astype(jnp.float32)                        # (Bn, C, HWp)
        if need_mask:
            lane = lax.broadcasted_iota(jnp.int32, (1, 1, hw_pad), 2)
            valid = lane < hw_true
            sums = jnp.sum(jnp.where(valid, xf, 0.0), axis=-1)     # (Bn, C)
            maxs = jnp.max(jnp.where(valid, xf, -jnp.inf), axis=-1)
        else:
            sums = jnp.sum(xf, axis=-1)                            # (Bn, C)
            maxs = jnp.max(xf, axis=-1)                            # (Bn, C)
        avg = sums * inv_hw                                        # true-HW mean

        # ---- Shared MLP fused across all Bn images (MXU RHS width = 2*Bn) ----
        pooled = jnp.concatenate([avg, maxs], axis=0)              # (2*Bn, C)
        w1 = w1_ref[...]                                           # (Cr, C)
        w2 = w2_ref[...]                                           # (C, Cr)
        h = lax.dot_general(pooled, w1, (((1,), (1,)), ((), ())),
                            preferred_element_type=jnp.float32)    # (2*Bn, Cr)
        h = jnp.maximum(h, 0.0)
        z = lax.dot_general(h, w2, (((1,), (1,)), ((), ())),
                            preferred_element_type=jnp.float32)    # (2*Bn, C)

        # gate = sigmoid(fc(avg) + fc(max))  per image, per channel.
        gate = jax.nn.sigmoid(z[:Bn] + z[Bn:])                     # (Bn, C)

        # ---- Gate: re-read the ref (stream from VMEM, don't pin x in vregs) ----
        o_ref[...] = (x_ref[...].astype(jnp.float32)
                      * gate[:, :, None]).astype(o_ref.dtype)

    return kernel


# --------------------------------------------------------------------------
# Wrapper
# --------------------------------------------------------------------------
def channel_attention(x_nchw, w1, w2, *, block_bytes_target=4 * 1024 * 1024):
    """x_nchw: (N, C, H, W) f32 or bf16.  w1: (C//r, C).  w2: (C, C//r)."""
    N, C, H, W = x_nchw.shape
    HW = H * W
    Cr = w1.shape[0]
    dtype = x_nchw.dtype
    itemsize = jnp.dtype(dtype).itemsize

    # --- lane-dense spatial axis: pad H*W to a multiple of 128 (free reshape stays NCHW)
    HWp = max(128, ((HW + 127) // 128) * 128)
    x2 = x_nchw.reshape(N, C, HW)
    if HWp != HW:
        x2 = jnp.pad(x2, ((0, 0), (0, 0), (0, HWp - HW)))

    # --- generation-aware VMEM capacity
    try:
        vmem_cap = int(getattr(pltpu.get_tpu_info(), "vmem_capacity_bytes",
                               64 * 1024 * 1024))
    except Exception:
        vmem_cap = 64 * 1024 * 1024

    # --- batch images per grid step: ~1-4 MiB input blocks, but keep >=2 grid
    #     steps when N >= 2 so the parallel axis feeds both v7x TensorCores.
    per_image = C * HWp * itemsize
    Bn = max(1, min(N, block_bytes_target // per_image))
    if N >= 2 and pl.cdiv(N, Bn) < 2:
        Bn = pl.cdiv(N, 2)
    Np = pl.cdiv(N, Bn) * Bn
    if Np != N:
        # zero-padded images: gate(0-image) * 0 = 0, sliced off below.
        x2 = jnp.pad(x2, ((0, Np - N), (0, 0), (0, 0)))
    grid = (Np // Bn,)

    # --- explicit VMEM limit: 2x in-block + 2x out-block (double buffered) + weights
    block_bytes = Bn * C * HWp * itemsize
    weight_bytes = (w1.size + w2.size) * 4
    needed = 4 * block_bytes + 4 * weight_bytes + (2 << 20)
    vmem_limit = int(min(0.75 * vmem_cap, max(needed, 32 * 1024 * 1024)))

    kernel = _make_kernel(HW, HWp)

    out = pl.pallas_call(
        kernel,
        out_shape=jax.ShapeDtypeStruct((Np, C, HWp), dtype),
        grid=grid,
        in_specs=[
            pl.BlockSpec((Bn, C, HWp), lambda n: (n, 0, 0)),
            pl.BlockSpec((Cr, C), lambda n: (0, 0)),   # weights resident across steps
            pl.BlockSpec((C, Cr), lambda n: (0, 0)),
        ],
        out_specs=pl.BlockSpec((Bn, C, HWp), lambda n: (n, 0, 0)),
        compiler_params=pltpu.CompilerParams(
            dimension_semantics=("parallel",),
            vmem_limit_bytes=vmem_limit),
    )(x2, w1.astype(jnp.float32), w2.astype(jnp.float32))

    return out[:N, :, :HW].reshape(N, C, H, W)


# --------------------------------------------------------------------------
# Self-test
# --------------------------------------------------------------------------
def _reference(x, w1, w2):
    xf = x.astype(jnp.float32)
    avg = jnp.mean(xf, axis=(2, 3))                                # (N, C)
    mxv = jnp.max(xf, axis=(2, 3))                                 # (N, C)
    fc = lambda v: jnp.maximum(v @ w1.T, 0.0) @ w2.T               # shared MLP
    gate = jax.nn.sigmoid(fc(avg) + fc(mxv))[:, :, None, None]
    return xf * gate


if __name__ == "__main__":
    reduction = 16
    fwd = jax.jit(channel_attention)

    # ---- test 1: f32, lane-dense spatial (16x16 = 256) ----
    N, C, H, W = 2, 32, 16, 16
    Cr = C // reduction
    kx, k1, k2 = jax.random.split(jax.random.PRNGKey(0), 3)
    x = jax.random.normal(kx, (N, C, H, W), jnp.float32)
    w1 = 0.2 * jax.random.normal(k1, (Cr, C), jnp.float32)
    w2 = 0.2 * jax.random.normal(k2, (C, Cr), jnp.float32)

    out = jax.block_until_ready(fwd(x, w1, w2))
    ref = _reference(x, w1, w2)
    assert out.shape == (N, C, H, W) and out.dtype == jnp.float32
    assert jnp.allclose(out, ref, rtol=1e-5, atol=1e-5), \
        float(jnp.max(jnp.abs(out - ref)))

    # ---- test 2: bf16 I/O, non-128-multiple spatial (7x7=49), odd batch (padding path) ----
    N2, C2, H2, W2 = 3, 32, 7, 7
    Cr2 = C2 // reduction
    kx2, k12, k22 = jax.random.split(jax.random.PRNGKey(1), 3)
    x_b = jax.random.normal(kx2, (N2, C2, H2, W2), jnp.float32).astype(jnp.bfloat16)
    w1_b = 0.2 * jax.random.normal(k12, (Cr2, C2), jnp.float32)
    w2_b = 0.2 * jax.random.normal(k22, (C2, Cr2), jnp.float32)

    out_b = jax.block_until_ready(fwd(x_b, w1_b, w2_b))
    ref_b = _reference(x_b, w1_b, w2_b)
    assert out_b.shape == (N2, C2, H2, W2) and out_b.dtype == jnp.bfloat16
    assert jnp.allclose(out_b.astype(jnp.float32), ref_b, rtol=2e-2, atol=2e-2), \
        float(jnp.max(jnp.abs(out_b.astype(jnp.float32) - ref_b)))

    print("KERNEL_OK")
</pallas_src>

<mosaic_0001>
module attributes {stable_mosaic.version = 11 : i64} {
  func.func @kernel(%arg0: i32, %arg1: memref<1x32x256xf32, #tpu.memory_space<vmem>>, %arg2: memref<2x32xf32, #tpu.memory_space<vmem>>, %arg3: memref<32x2xf32, #tpu.memory_space<vmem>>, %arg4: memref<1x32x256xf32, #tpu.memory_space<vmem>>) attributes {dimension_semantics = [#tpu.dimension_semantics<parallel>], iteration_bounds = array<i64: 2>, scalar_prefetch = 0 : i64, scratch_operands = 0 : i64, tpu.core_type = #tpu.core_type<tc>, window_params = [{transform_indices = @transform_0, window_bounds = array<i64: 1, 32, 256>}, {pipeline_mode = #tpu.pipeline_mode<synchronous>, transform_indices = @transform_1, window_bounds = array<i64: 2, 32>}, {pipeline_mode = #tpu.pipeline_mode<synchronous>, transform_indices = @transform_2, window_bounds = array<i64: 32, 2>}, {transform_indices = @transform_3, window_bounds = array<i64: 1, 32, 256>}]} {
    %c0 = arith.constant 0 : index
    %c0_0 = arith.constant 0 : index
    %c0_1 = arith.constant 0 : index
    %0 = vector.load %arg1[%c0, %c0_0, %c0_1] : memref<1x32x256xf32, #tpu.memory_space<vmem>>, vector<1x32x256xf32>
    %cst = arith.constant dense<0.000000e+00> : vector<1x32xf32>
    %1 = vector.multi_reduction <add>, %0, %cst [2] : vector<1x32x256xf32> to vector<1x32xf32>
    %cst_2 = arith.constant dense<0xFF800000> : vector<1x32xf32>
    %2 = vector.multi_reduction <maximumf>, %0, %cst_2 [2] : vector<1x32x256xf32> to vector<1x32xf32>
    %cst_3 = arith.constant 3.906250e-03 : f32
    %3 = vector.broadcast %cst_3 : f32 to vector<1x32xf32>
    %4 = arith.mulf %1, %3 : vector<1x32xf32>
    %5 = tpu.concatenate %4, %2 in 0 : vector<1x32xf32>, vector<1x32xf32> -> vector<2x32xf32>
    %c0_4 = arith.constant 0 : index
    %c0_5 = arith.constant 0 : index
    %6 = vector.load %arg2[%c0_4, %c0_5] : memref<2x32xf32, #tpu.memory_space<vmem>>, vector<2x32xf32>
    %c0_6 = arith.constant 0 : index
    %c0_7 = arith.constant 0 : index
    %7 = vector.load %arg3[%c0_6, %c0_7] : memref<32x2xf32, #tpu.memory_space<vmem>>, vector<32x2xf32>
    %cst_8 = arith.constant dense<0.000000e+00> : vector<2x2xf32>
    %8 = tpu.matmul %5, %6, %cst_8 {dimension_numbers = #tpu.dot_dimension_numbers<[1], [1], [0], [0], [0, 0, 1, 0], [], []>} : vector<2x32xf32>, vector<2x32xf32>, vector<2x2xf32> -> vector<2x2xf32>
    %cst_9 = arith.constant 0.000000e+00 : f32
    %9 = vector.broadcast %cst_9 : f32 to vector<2x2xf32>
    %10 = arith.maximumf %8, %9 : vector<2x2xf32>
    %cst_10 = arith.constant dense<0.000000e+00> : vector<2x32xf32>
    %11 = tpu.matmul %10, %7, %cst_10 {dimension_numbers = #tpu.dot_dimension_numbers<[1], [1], [0], [0], [0, 0, 1, 0], [], []>} : vector<2x2xf32>, vector<32x2xf32>, vector<2x32xf32> -> vector<2x32xf32>
    %12 = vector.extract_strided_slice %11 {offsets = [0, 0], sizes = [1, 32], strides = [1, 1]} : vector<2x32xf32> to vector<1x32xf32>
    %13 = vector.extract_strided_slice %11 {offsets = [1, 0], sizes = [1, 32], strides = [1, 1]} : vector<2x32xf32> to vector<1x32xf32>
    %14 = arith.addf %12, %13 : vector<1x32xf32>
    %15 = arith.negf %14 : vector<1x32xf32>
    %16 = math.exp %15 : vector<1x32xf32>
    %cst_11 = arith.constant 1.000000e+00 : f32
    %17 = vector.broadcast %cst_11 : f32 to vector<1x32xf32>
    %18 = arith.addf %17, %16 : vector<1x32xf32>
    %19 = arith.divf %17, %18 : vector<1x32xf32>
    %c0_12 = arith.constant 0 : index
    %c0_13 = arith.constant 0 : index
    %c0_14 = arith.constant 0 : index
    %20 = vector.load %arg1[%c0_12, %c0_13, %c0_14] : memref<1x32x256xf32, #tpu.memory_space<vmem>>, vector<1x32x256xf32>
    %21 = vector.shape_cast %19 : vector<1x32xf32> to vector<1x32x1xf32>
    %22 = vector.broadcast %21 : vector<1x32x1xf32> to vector<1x32x256xf32>
    %23 = arith.mulf %20, %22 : vector<1x32x256xf32>
    %c0_15 = arith.constant 0 : index
    %c0_16 = arith.constant 0 : index
    %c0_17 = arith.constant 0 : index
    %24 = vector.load %arg4[%c0_15, %c0_16, %c0_17] : memref<1x32x256xf32, #tpu.memory_space<vmem>>, vector<1x32x256xf32>
    tpu.vector_store %arg4[%c0_15, %c0_16, %c0_17], %23 {strides = array<i32>} : memref<1x32x256xf32, #tpu.memory_space<vmem>>, vector<1x32x256xf32>,
    return
  }
  func.func @transform_0(%arg0: i32) -> (i32, i32, i32) {
    %c0_i32 = arith.constant 0 : i32
    %c0_i32_0 = arith.constant 0 : i32
    %c0_i32_1 = arith.constant 0 : i32
    return %arg0, %c0_i32, %c0_i32_0 : i32, i32, i32
  }
  func.func @transform_1(%arg0: i32) -> (i32, i32) {
    %c0_i32 = arith.constant 0 : i32
    %c0_i32_0 = arith.constant 0 : i32
    %c0_i32_1 = arith.constant 0 : i32
    return %c0_i32, %c0_i32_0 : i32, i32
  }
  func.func @transform_2(%arg0: i32) -> (i32, i32) {
    %c0_i32 = arith.constant 0 : i32
    %c0_i32_0 = arith.constant 0 : i32
    %c0_i32_1 = arith.constant 0 : i32
    return %c0_i32, %c0_i32_0 : i32, i32
  }
  func.func @transform_3(%arg0: i32) -> (i32, i32, i32) {
    %c0_i32 = arith.constant 0 : i32
    %c0_i32_0 = arith.constant 0 : i32
    %c0_i32_1 = arith.constant 0 : i32
    return %arg0, %c0_i32, %c0_i32_0 : i32, i32, i32
  }
}

</mosaic_0001>

<bundles_post_ra>
// kernel: channel_attention.1
= control target key start
LH: loop header
LB: loop body
LE: loop exit
PB: predicated region body
PF: predicated region fallthrough
CT: control target
= control target key end

     0   :  { %s632_s12 = smov 0   ;;  %s718_s0 = inlined_call_operand.vmem [shape: f32[2,32,256], index: 0, kind: input, shape index: {}]   ;;  %s719_s1 = inlined_call_operand.vmem [shape: f32[2,32], index: 1, kind: input, shape index: {}]   ;;  %s720_s2 = inlined_call_operand.vmem [shape: f32[32,2], index: 2, kind: input, shape index: {}]   ;;  %s721_s3 = inlined_call_operand.vmem [shape: f32[2,32,256], index: 3, kind: output, shape index: {}]  }
   0x1 LB: > { %s534_s13 = sadd.s32 4294967295, %s607_s12   ;;  %p538_p0 = scmp.ge.s32.totalorder %s607_s12, 1  ;;  %s607_s12 = sphi %s632_s12, %s13_s12  }
   0x2   : > { %p137_p1 = scmp.lt.s32.totalorder %s607_s12, 3 }
   0x4   : > { %p138_p2 = pnand %p538_p0, %p137_p1 }
   0x5   : > { %p161_p3 = scmp.lt.s32.totalorder (!%p138_p2), %s534_s13, 1  ;;  %v609_v16 = vmov (!%p138_p2), 0.0   ;;  %v265_v17 = vld [vmem:[%s719_s1] sm:$0x3] (!%p138_p2)  ;;  %vm270_vm0 = vcmask (!%p138_p2), 261120   ;;  %vm610_vm1 = vmmov (!%p138_p2), 0   ;;  %v211_v25 = vlaneseq (!%p138_p2) }
   0x6   : > { %141 = sbr.rel (%p138_p2) target bundleno = 763 (0x2fb), region = 32  ;;  %562 = vmatprep.subr.mxu0 (!%p138_p2), %v609_v16  ;;  %564 = vmatprep.mubr.msk.f32.mxu0 (!%p138_p2), %vm610_vm1, %v609_v16  ;;  %v266_v18 = vld [vmem:[%s720_s2] sm:$0xff] (!%p138_p2)  ;;  %v267_v19 = vld [vmem:[%s720_s2 + $0x8] sm:$0xff] (!%p138_p2)  ;;  %vm348_vm2 = vcmask (!%p138_p2), 15360   ;;  %v611_v20 = vmov (!%p138_p2), 0.0|0.0   ;;  %v268_v22 = vld [vmem:[%s720_s2 + $0x10] sm:$0xff] (!%p138_p2) }
   0x7   : > { %563 = vmatpush3.xpose.msk.msra.mxu0 (!%p138_p2), %vm270_vm0, %v265_v17  ;;  %575 = vmatprep.mubr.msk.f32.mxu1 (!%p138_p2), %vm610_vm1, %v609_v16  ;;  %v579_v21 = vpack.c.bf16 (!%p138_p2), %v267_v19, %v266_v18  ;;  %vm580_vm3 = vmpackc.low (!%p138_p2), %vm348_vm2, %vm348_vm2  ;;  %v269_v23 = vld [vmem:[%s720_s2 + $0x18] sm:$0xff] (!%p138_p2)  ;;  %v212_v26 = vand.u32 (!%p138_p2), 127, %v211_v25  ;;  %v214_v29 = vshrl.u32 (!%p138_p2), %v211_v25, 7  ;;  %vm222_vm4 = vcmask (!%p138_p2), 130112  }
   0x8   : > { %578 = vmatprep.subr.bf16.mxu1 (!%p138_p2), %v611_v20  ;;  %v583_v24 = vpack.c.bf16 (!%p138_p2), %v269_v23, %v268_v22  ;;  %vm229_vm5 = vcmask (!%p138_p2), 195712   ;;  %vm236_vm6 = vcmask (!%p138_p2), 261312   ;;  %vm263_vm7 = vcmask (!%p138_p2), 1040384  }
   0x9   : > { %581 = vmatpush3.bf16.xpose.msk.msra.mxu1 (!%p138_p2), %vm580_vm3, %v579_v21  ;;  %v217_v28 = vadd.s32 (!%p138_p2), 4294967288, %v212_v26  ;;  %v224_v31 = vadd.s32 (!%p138_p2), 4294967280, %v212_v26  ;;  %v215_v34 = vsub.s32 (!%p138_p2), %v212_v26, %v214_v29  ;;  %v231_v36 = vadd.s32 (!%p138_p2), 4294967272, %v212_v26 }
   0xa   : > { %582 = vmatprep.subr.bf16.mxu1 (!%p138_p2), %v611_v20  ;;  %v446_v16 = vsub.s32 (!%p138_p2), 0, %v214_v29 }
   0xb   : > { %v220_v33 = vsub.s32 (!%p138_p2), %v217_v28, %v214_v29  ;;  %v227_v39 = vsub.s32 (!%p138_p2), %v224_v31, %v214_v29  ;;  %v234_v44 = vsub.s32 (!%p138_p2), %v231_v36, %v214_v29 }
   0xd   : > { %s723_s13 = smov (!%p161_p3, %s534_s13), 1 }
   0xe   : > { %s553_s14 = sshll.u32 %s723_s13, 6 }
   0xf   : > { %s165_s17 = scalar_lea.vmem %s718_s0, %s553_s14  ;;  %s170_s30 = scalar_lea.vmem %s721_s3, %s553_s14 }
  0x10   : > { %v648_v0 = vld [vmem:[%s165_s17 + $0x20] sm:$0xff]  ;;  %v650_v1 = vld [vmem:[%s165_s17 + $0x28] sm:$0xff]  ;;  %v658_v5 = vld [vmem:[%s165_s17 + $0x30] sm:$0xff] }
  0x11   : > { %v652_v2 = vld [vmem:[%s165_s17] sm:$0xff]  ;;  %v185_v3 = vadd.f32 %v650_v1, %v648_v0  ;;  %v656_v4 = vld [vmem:[%s165_s17 + $0x8] sm:$0xff]  ;;  %v660_v6 = vld [vmem:[%s165_s17 + $0x38] sm:$0xff]  ;;  %v197_v15 = vmax.f32 %v648_v0, %v650_v1  ;;  %585 = vmatpush3.bf16.xpose.msk.msra.mxu1 %vm580_vm3, %v583_v24 }
  0x12   : > { %v179_v7 = vadd.f32 %v656_v4, %v652_v2  ;;  %v664_v8 = vld [vmem:[%s165_s17 + $0x10] sm:$0xff]  ;;  %v666_v9 = vld [vmem:[%s165_s17 + $0x18] sm:$0xff]  ;;  %v188_v10 = vadd.f32 %v660_v6, %v658_v5  ;;  %v191_v13 = vmax.f32 %v652_v2, %v656_v4  ;;  %v200_v14 = vmax.f32 %v658_v5, %v660_v6 }
  0x13   : > { %186 = vadd.xlane.f32.xlu1 %v185_v3  ;;  %v182_v11 = vadd.f32 %v666_v9, %v664_v8  ;;  %v194_v12 = vmax.f32 %v664_v8, %v666_v9 }
  0x14   : > { %180 = vadd.xlane.f32.xlu0 %v179_v7 }
  0x17   : > { %189 = vadd.xlane.f32.xlu1 %v188_v10 }
  0x18   : > { %183 = vadd.xlane.f32.xlu0 %v182_v11 }
  0x1b   : > { %195 = vmax.xlane.f32.xlu1 %v194_v12 }
  0x1c   : > { %192 = vmax.xlane.f32.xlu0 %v191_v13 }
  0x1f   : > { %201 = vmax.xlane.f32.xlu1 %v200_v14 }
  0x20   : > { %198 = vmax.xlane.f32.xlu0 %v197_v15 }
  0xa0   : > { %v187_v27 = vpop.xlane.xlu1 %186 }
  0xa1   : > { %v181_v30 = vpop.xlane.xlu0 %180  ;;  %v205_v40 = vmul.f32 0.00390625, %v187_v27 }
  0xa2   : > { %v203_v35 = vmul.f32 0.00390625, %v181_v30 }
  0xa3   : > { %v228_v50 = vrot.slane %v205_v40, %v227_v39 }
  0xa4   : > { %v190_v32 = vpop.xlane.xlu1 %189  ;;  %v216_v43 = vrot.slane %v203_v35, %v215_v34 }
  0xa5   : > { %v184_v37 = vpop.xlane.xlu0 %183  ;;  %v206_v45 = vmul.f32 0.00390625, %v190_v32 }
  0xa6   : > { %v204_v38 = vmul.f32 0.00390625, %v184_v37 }
  0xa7   : > { %v235_v52 = vrot.slane %v206_v45, %v234_v44 }
  0xa8   : > { %v221_v41 = vrot.slane %v204_v38, %v220_v33  ;;  %v196_v42 = vpop.xlane.xlu1 %195 }
  0xa9   : > { %v193_v46 = vpop.xlane.xlu0 %192  ;;  %v250_v48 = vrot.slane %v196_v42, %v220_v33 }
  0xaa   : > { %v223_v47 = vsel %vm222_vm4, %v221_v41, %v216_v43  ;;  %v246_v49 = vrot.slane %v193_v46, %v215_v34 }
  0xab   : > { %v230_v56 = vsel %vm229_vm5, %v228_v50, %v223_v47 }
  0xac   : > { %v202_v51 = vpop.xlane.xlu1 %201  ;;  %v251_v57 = vsel %vm222_vm4, %v250_v48, %v246_v49  ;;  %v237_v60 = vsel %vm236_vm6, %v235_v52, %v230_v56 }
  0xad   : > { %v199_v53 = vpop.xlane.xlu0 %198  ;;  %v260_v54 = vrot.slane %v202_v51, %v234_v44 }
  0xae   : > { %v255_v55 = vrot.slane %v199_v53, %v227_v39 }
  0xb0   : > { %v256_v58 = vsel %vm229_vm5, %v255_v55, %v251_v57 }
  0xb1   : > { %v261_v59 = vsel %vm236_vm6, %v260_v54, %v256_v58 }
  0xb2   : > { %v264_v61 = vsel %vm263_vm7, %v237_v60, %v261_v59 }
  0xb3   : > { %565 = vmatmul.mubr.msk.f32.vlgmr.msra.gmra.mrb[0].mxu0 %vm270_vm0, %v264_v61 }
 0x186   : > { %v343_v62 = vpop.f32.mrb[0].mxu0 }
 0x187   : > { %v347_v63 = vmax.f32 %v343_v62, 0.0  ;;  %v566_v3 = vpop.f32.mrb[1].mxu0 }
 0x189   : > { %576 = vmatmul.mubr.msk.f32.vlgmr.msra.gmra.mrb[0].mxu1 %vm348_vm2, %v347_v63 }
 0x25c   : > { %v430_v7 = vpop.f32.mrb[0].mxu1 }
 0x25d   : > { %v435_v10 = vrot.slane %v430_v7, 1  ;;  %v577_v11 = vpop.f32.mrb[1].mxu1 }
 0x25f   : > { %v437_v12 = vadd.f32 %v435_v10, %v430_v7 }
 0x261   : > { %v550_v13 = vmul.f32 -1.442695, %v437_v12 }
 0x263   : > { %597 = vpow2.f32 %v550_v13 }
 0x26d   : > { %v598_v14 = vpop.eup %597 }
 0x26e   : > { %v441_v15 = vadd.f32 1.0, %v598_v14 }
 0x270   : > { %599 = vrcp.f32 %v441_v15 }
 0x27a   : > { %v600_v17 = vpop.eup %599 }
 0x27b   : > { %v447_v18 = vrot.slane %v600_v17, %v446_v16 }
 0x27d   : > { %453 = vbcast.lane.b32.xlu1 %v447_v18, 264  ;;  %449 = vbcast.lane.b32.xlu0 %v447_v18, 256 }
 0x281   : > { %457 = vbcast.lane.b32.xlu1 %v447_v18, 272 }
 0x285   : > { %461 = vbcast.lane.b32.xlu1 %v447_v18, 280 }
 0x2ef   : > { %v454_v19 = vpop.permute.xlu1 %453  ;;  %v450_v20 = vpop.permute.xlu0 %449 }
 0x2f0   : > { %v465_v21 = vmul.f32 %v454_v19, %v664_v8  ;;  %v466_v22 = vmul.f32 %v454_v19, %v666_v9  ;;  %v463_v23 = vmul.f32 %v450_v20, %v652_v2  ;;  %v464_v24 = vmul.f32 %v450_v20, %v656_v4 }
 0x2f2   : > { %473 = vst [vmem:[%s170_s30 + $0x10] sm:$0xff] %v465_v21  ;;  %474 = vst [vmem:[%s170_s30 + $0x18] sm:$0xff] %v466_v22 }
 0x2f3   : > { %471 = vst [vmem:[%s170_s30] sm:$0xff] %v463_v23  ;;  %472 = vst [vmem:[%s170_s30 + $0x8] sm:$0xff] %v464_v24  ;;  %v458_v25 = vpop.permute.xlu1 %457 }
 0x2f4   : > { %v467_v26 = vmul.f32 %v458_v25, %v648_v0  ;;  %v468_v27 = vmul.f32 %v458_v25, %v650_v1 }
 0x2f6   : > { %475 = vst [vmem:[%s170_s30 + $0x20] sm:$0xff] %v467_v26  ;;  %476 = vst [vmem:[%s170_s30 + $0x28] sm:$0xff] %v468_v27 }
 0x2f7   : > { %v462_v28 = vpop.permute.xlu1 %461 }
 0x2f8   : > { %v469_v8 = vmul.f32 %v462_v28, %v658_v5  ;;  %v470_v9 = vmul.f32 %v462_v28, %v660_v6 }
 0x2fa   : > { %477 = vst [vmem:[%s170_s30 + $0x30] sm:$0xff] %v469_v8  ;;  %478 = vst [vmem:[%s170_s30 + $0x38] sm:$0xff] %v470_v9 }
 0x2fb PF: > { %s13_s12 = sadd.s32 1, %s607_s12  }
 0x2fc   : > { %p10_p4 = scmp.ge.s32.totalorder %s13_s12, 4  }
 0x2fe   :  { %12 = sbr.rel (!%p10_p4) target bundleno = 1 (0x1), region = 62 }

</bundles_post_ra>
